<compile_context>
chip_gen: v5e
topology: v5e:2x2
jax: 0.10.0
libtpu: 0.0.40
codegen_flags: <defaults>
</compile_context>

<pallas_src>
import functools

import jax
import jax.numpy as jnp
from jax.experimental import pallas as pl
from jax.experimental.pallas import tpu as pltpu


def _round_up(x, m):
    return ((x + m - 1) // m) * m


@functools.lru_cache(maxsize=None)
def _vmem_limit_bytes():
    # v5e/v6e have 128 MiB physical VMEM -> allow ~100 MiB; v7x has 64 MiB
    # -> ~56 MiB.  Falls back to a conservative 48 MiB if the query fails.
    try:
        cap = int(pltpu.get_tpu_info().vmem_capacity_bytes)
        return int(min(100 * 1024 * 1024, (cap * 7) // 8))
    except Exception:
        return 48 * 1024 * 1024


def _make_ck_kernel(*, taps, cb, t_rows, n_strips, pe_valid, pe_pad,
                    wrap_ws, wrap_ow, n_valid, apply_inst_norm,
                    eps=1e-5, slope=0.2):
    """Build the per-sample Ck kernel.

    taps     : flat row offsets of the 2x2 space-to-depth taps ((0,) when the
               wrapper already did the full im2col)
    cb       : channels per tap in the activation input
    t_rows   : rows per strip (one MXU matmul / epilogue step per strip)
    pe_valid : number of real flat output rows (before strip padding)
    pe_pad   : padded row count (= n_strips * t_rows)
    wrap_ws  : flat row stride (OW+1) of the space-to-depth grid, or None when
               there is no wrap column (im2col path)
    """
    num_taps = len(taps)
    inv_n = 1.0 / float(n_valid)
    need_row_bound = pe_pad != pe_valid
    align = t_rows & (-t_rows)        # power-of-two alignment hint for pl.ds

    def _lhs(xf_ref, lhs_ref, base):
        # (t_rows, num_taps*cb) bf16 matmul LHS for output rows [base, base+T).
        if num_taps == 1:
            return xf_ref[0, pl.ds(base, t_rows), :].astype(jnp.bfloat16)
        for k, off in enumerate(taps):
            lhs_ref[:, k * cb:(k + 1) * cb] = (
                xf_ref[0, pl.ds(base + off, t_rows), :].astype(jnp.bfloat16))
        return lhs_ref[...]

    def _conv(xf_ref, w_ref, lhs_ref, base):
        lhs = _lhs(xf_ref, lhs_ref, base)
        return jnp.dot(lhs, w_ref[...], preferred_element_type=jnp.float32)

    if apply_inst_norm:

        def kernel(xf_ref, w_ref, o_ref, *scratch):
            lhs_ref = scratch[0] if scratch else None
            coutp = w_ref.shape[-1]
            i_local = jax.lax.broadcasted_iota(jnp.int32, (t_rows, 1), 0)

            # Strip-invariant wrap-column mask (strip height is a multiple of
            # the padded row width): built once from a few static compares --
            # no HBM mask input, no big VMEM constant, no vector int mod.
            wrap_mask = None
            if wrap_ws is not None:
                ok = None
                for j in range(t_rows // wrap_ws):
                    cmp = i_local != (wrap_ow + j * wrap_ws)
                    ok = cmp if ok is None else jnp.logical_and(ok, cmp)
                wrap_mask = ok.astype(jnp.float32)

            # ---- pass 1: conv (one matmul per strip) + masked stats --------
            def conv_strip(t, carry):
                s1, s2 = carry
                base = pl.multiple_of(t * t_rows, align)
                y = _conv(xf_ref, w_ref, lhs_ref, base)          # (T, Coutp) f32
                m = wrap_mask
                if need_row_bound:
                    rb = ((base + i_local) < pe_valid).astype(jnp.float32)
                    m = rb if m is None else m * rb
                ym = y if m is None else y * m
                s1 = s1 + jnp.sum(ym, axis=0, keepdims=True)
                s2 = s2 + jnp.sum(ym * y, axis=0, keepdims=True)
                o_ref[0, pl.ds(base, t_rows), :] = y.astype(o_ref.dtype)
                return s1, s2

            zero = jnp.zeros((1, coutp), jnp.float32)
            s1, s2 = jax.lax.fori_loop(0, n_strips, conv_strip, (zero, zero))

            # Single-pass f32 stats (biased var, matching InstanceNorm2d).
            # Padded output channels have s1 == s2 == 0 -> var clamps to 0 and
            # rsqrt(eps) stays finite (padding sliced off in the wrapper).
            mean = s1 * inv_n
            var = jnp.maximum(s2 * inv_n - mean * mean, 0.0)
            rstd = jax.lax.rsqrt(var + eps)

            # ---- pass 2: normalize + LeakyReLU, in place on the output -----
            def norm_strip(t, carry):
                base = pl.multiple_of(t * t_rows, align)
                y = o_ref[0, pl.ds(base, t_rows), :].astype(jnp.float32)
                y = (y - mean) * rstd
                o_ref[0, pl.ds(base, t_rows), :] = (
                    jnp.maximum(y, slope * y).astype(o_ref.dtype))
                return carry

            jax.lax.fori_loop(0, n_strips, norm_strip, 0)

    else:

        def kernel(xf_ref, w_ref, b_ref, o_ref, *scratch):
            lhs_ref = scratch[0] if scratch else None

            def strip(t, carry):
                base = pl.multiple_of(t * t_rows, align)
                y = _conv(xf_ref, w_ref, lhs_ref, base) + b_ref[...]
                o_ref[0, pl.ds(base, t_rows), :] = (
                    jnp.maximum(y, slope * y).astype(o_ref.dtype))
                return carry

            jax.lax.fori_loop(0, n_strips, strip, 0)

    return kernel


def _ck_nhwc(x_nhwc, weight, bias, *, inst_norm, out_dtype=jnp.float32):
    N, H, W, Cin = x_nhwc.shape
    Cout = weight.shape[0]
    if H % 2 or W % 2:
        raise ValueError("Ck expects even H and W (stride-2 conv).")

    OH, OW = H // 2, W // 2
    Hs, Ws = OH + 1, OW + 1
    C4 = 4 * Cin                       # channels after factor-2 space-to-depth
    KC = 4 * C4                        # full 4x4 contraction depth = 16*Cin
    Coutp = _round_up(Cout, 128)       # lane-dense output channels

    # ---- glue (pure JAX, ~1x data movement): pad + space-to-depth ----------
    x = x_nhwc.astype(jnp.float32)
    xp = jnp.pad(x, ((0, 0), (1, 1), (1, 1), (0, 0)))            # conv padding
    xs = (xp.reshape(N, Hs, 2, Ws, 2, Cin)
            .transpose(0, 1, 3, 2, 4, 5)
            .reshape(N, Hs, Ws, C4))

    # weight (Cout,Cin,4,4) -> (16*Cin, Coutp) bf16 with
    #   row = k*C4 + (2*rh+rw)*Cin + c, k = 2*(dh//2)+(dw//2), rh=dh%2, rw=dw%2
    wflat = (weight.astype(jnp.float32)
                   .reshape(Cout, Cin, 2, 2, 2, 2)
                   .transpose(2, 4, 3, 5, 1, 0)
                   .reshape(KC, Cout))
    wflat = jnp.pad(wflat, ((0, 0), (0, Coutp - Cout))).astype(jnp.bfloat16)

    small_cin = (C4 % 128) != 0
    if small_cin:
        # First-layer style: full 4x4 im2col in the wrapper (still small) so
        # the kernel sees a dense K = 16*Cin lane dim and a single tap.
        taps, cb = (0,), KC
        pe_valid = OH * OW
        wrap_ws = wrap_ow = None
        cols = [xs[:, a:a + OH, b:b + OW, :]
                for (a, b) in ((0, 0), (0, 1), (1, 0), (1, 1))]
        xflat = jnp.concatenate(cols, axis=-1).reshape(N, pe_valid, KC)
        t_rows = 512 if pe_valid > 512 else _round_up(pe_valid, 16)
    else:
        # Space-to-depth path: stride-2 4x4 conv == stride-1 2x2 conv over xs;
        # the 4 taps are contiguous shifted views of the flattened grid.
        taps, cb = (0, 1, Ws, Ws + 1), C4
        pe_valid = OH * Ws              # one wrap column per output row
        wrap_ws, wrap_ow = Ws, OW
        xflat = xs.reshape(N, Hs * Ws, C4)
        k_img_rows = 16 if OH > 16 else OH
        t_rows = k_img_rows * Ws        # multiple of Ws (and of 16 when OH>16)

    pe_pad = _round_up(pe_valid, t_rows)
    n_strips = pe_pad // t_rows
    rows_needed = pe_pad + max(taps)    # keep all shifted strip reads in bounds
    pf = _round_up(rows_needed, 8)
    xflat = jnp.pad(xflat, ((0, 0), (0, pf - xflat.shape[1]), (0, 0)))

    kernel = _make_ck_kernel(
        taps=taps, cb=cb, t_rows=t_rows, n_strips=n_strips,
        pe_valid=pe_valid, pe_pad=pe_pad, wrap_ws=wrap_ws, wrap_ow=wrap_ow,
        n_valid=OH * OW, apply_inst_norm=inst_norm)

    in_specs = [
        pl.BlockSpec((1, pf, cb), lambda n: (n, 0, 0)),    # per-sample activations
        # NOTE: constant index map -> no re-DMA across grid steps; could be
        # single-buffered (pipeline_mode=pl.Buffered(1)) for extra VMEM
        # headroom on v7x, kept default-buffered for portability.
        pl.BlockSpec((KC, Coutp), lambda n: (0, 0)),       # resident packed weight
    ]
    inputs = [xflat, wflat]
    if not inst_norm:
        bp = jnp.pad(bias.astype(jnp.float32), (0, Coutp - Cout)).reshape(1, Coutp)
        in_specs.append(pl.BlockSpec((1, Coutp), lambda n: (0, 0)))
        inputs.append(bp)

    scratch_shapes = []
    if len(taps) > 1:
        scratch_shapes.append(pltpu.VMEM((t_rows, KC), jnp.bfloat16))

    out_flat = pl.pallas_call(
        kernel,
        out_shape=jax.ShapeDtypeStruct((N, pe_pad, Coutp), jnp.bfloat16),
        grid_spec=pltpu.PrefetchScalarGridSpec(
            num_scalar_prefetch=0,
            grid=(N,),
            in_specs=in_specs,
            out_specs=pl.BlockSpec((1, pe_pad, Coutp), lambda n: (n, 0, 0)),
            scratch_shapes=scratch_shapes,
        ),
        compiler_params=pltpu.CompilerParams(
            dimension_semantics=("parallel",),
            vmem_limit_bytes=_vmem_limit_bytes(),
        ),
    )(*inputs)

    # Drop strip padding / wrap column / channel padding; restore f32 during
    # the slice pass that is needed anyway.
    out = out_flat[:, :pe_valid, :]
    if small_cin:
        out = out.reshape(N, OH, OW, Coutp)[..., :Cout]
    else:
        out = out.reshape(N, OH, Ws, Coutp)[:, :, :OW, :Cout]
    return out.astype(out_dtype)


@functools.partial(jax.jit, static_argnames=("inst_norm",))
def ck_forward_nhwc(x_nhwc, weight, bias, inst_norm=True):
    """NHWC-in / NHWC-out Ck: (N,H,W,Cin) -> (N,H/2,W/2,Cout) f32.

    Preferred when chaining blocks: avoids the NCHW<->NHWC relayout passes
    whose HBM traffic rivals the kernel's own."""
    return _ck_nhwc(x_nhwc, weight, bias, inst_norm=inst_norm)


@functools.partial(jax.jit, static_argnames=("inst_norm",))
def ck_forward(x_nchw, weight, bias, inst_norm=True):
    """PyTorch-layout Ck: (N,Cin,H,W) f32 -> (N,Cout,H/2,W/2) f32."""
    x_nhwc = jnp.transpose(x_nchw, (0, 2, 3, 1))
    out = _ck_nhwc(x_nhwc, weight, bias, inst_norm=inst_norm)
    return jnp.transpose(out, (0, 3, 1, 2))


def _reference(x_nchw, weight, bias, inst_norm=True, eps=1e-5, slope=0.2):
    y = jax.lax.conv_general_dilated(
        x_nchw, weight,
        window_strides=(2, 2),
        padding=((1, 1), (1, 1)),
        dimension_numbers=("NCHW", "OIHW", "NCHW"),
    ) + bias.reshape(1, -1, 1, 1)
    if inst_norm:
        mean = jnp.mean(y, axis=(2, 3), keepdims=True)
        var = jnp.mean((y - mean) ** 2, axis=(2, 3), keepdims=True)
        y = (y - mean) / jnp.sqrt(var + eps)
    return jnp.where(y >= 0.0, y, slope * y)


if __name__ == "__main__":
    key = jax.random.PRNGKey(0)

    # (N, Cin, H, W, Cout): first config exercises the small-Cin (wrapper
    # im2col) path, second the space-to-depth + in-kernel K-concat path.
    configs = [(2, 4, 16, 16, 8), (1, 32, 16, 16, 64)]

    x = weight = bias = None
    for (N, Cin, H, W, Cout) in configs:
        kx, kw, kb, key = jax.random.split(key, 4)
        x = jax.random.normal(kx, (N, Cin, H, W), dtype=jnp.float32)
        weight = jax.random.normal(kw, (Cout, Cin, 4, 4), dtype=jnp.float32) * 0.1
        bias = jax.random.normal(kb, (Cout,), dtype=jnp.float32) * 0.1

        # bf16 MXU operands + bf16 activation writeback (per perf review);
        # tolerance grows mildly with contraction depth K = 16*Cin.
        tol = 3e-2 + 5e-4 * (16 * Cin) ** 0.5

        for inst_norm in (True, False):
            out = jax.block_until_ready(
                ck_forward(x, weight, bias, inst_norm=inst_norm))
            ref = _reference(x, weight, bias, inst_norm=inst_norm)
            assert out.shape == (N, Cout, H // 2, W // 2)
            err = float(jnp.max(jnp.abs(out - ref)))
            assert jnp.allclose(out, ref, atol=tol, rtol=tol), (Cin, inst_norm, err)

    # NHWC entry point (preferred for chained blocks) matches the NCHW wrapper.
    out_nhwc = jax.block_until_ready(
        ck_forward_nhwc(jnp.transpose(x, (0, 2, 3, 1)), weight, bias,
                        inst_norm=True))
    ref_nhwc = jnp.transpose(ck_forward(x, weight, bias, inst_norm=True),
                             (0, 2, 3, 1))
    assert jnp.allclose(out_nhwc, ref_nhwc, atol=1e-6, rtol=1e-6)

    print("KERNEL_OK")
</pallas_src>

<mosaic_0001>
module attributes {stable_mosaic.version = 11 : i64} {
  func.func @kernel(%arg0: i32, %arg1: memref<1x64x64xf32, #tpu.memory_space<vmem>>, %arg2: memref<64x128xbf16, #tpu.memory_space<vmem>>, %arg3: memref<1x64x128xbf16, #tpu.memory_space<vmem>>) attributes {dimension_semantics = [#tpu.dimension_semantics<parallel>], iteration_bounds = array<i64: 2>, scalar_prefetch = 0 : i64, scratch_operands = 0 : i64, tpu.core_type = #tpu.core_type<tc>, window_params = [{transform_indices = @transform_0, window_bounds = array<i64: 1, 64, 64>}, {pipeline_mode = #tpu.pipeline_mode<synchronous>, transform_indices = @transform_1, window_bounds = array<i64: 64, 128>}, {transform_indices = @transform_2, window_bounds = array<i64: 1, 64, 128>}]} {
    %cst = arith.constant 0.000000e+00 : f32
    %0 = vector.broadcast %cst : f32 to vector<1x128xf32>
    %c0_i32 = arith.constant 0 : i32
    %c64_i32 = arith.constant 64 : i32
    %1 = arith.muli %c0_i32, %c64_i32 : i32
    %2 = tpu.assume_multiple %1, 64 : i32
    %c0 = arith.constant 0 : index
    %3 = arith.index_cast %2 : i32 to index
    %c0_0 = arith.constant 0 : index
    %4 = vector.load %arg1[%c0, %3, %c0_0] : memref<1x64x64xf32, #tpu.memory_space<vmem>>, vector<1x64x64xf32>
    %5 = vector.shape_cast %4 : vector<1x64x64xf32> to vector<64x64xf32>
    %6 = arith.truncf %5 : vector<64x64xf32> to vector<64x64xbf16>
    %c0_1 = arith.constant 0 : index
    %c0_2 = arith.constant 0 : index
    %7 = vector.load %arg2[%c0_1, %c0_2] : memref<64x128xbf16, #tpu.memory_space<vmem>>, vector<64x128xbf16>
    %cst_3 = arith.constant dense<0.000000e+00> : vector<64x128xf32>
    %8 = tpu.matmul %6, %7, %cst_3 {dimension_numbers = #tpu.dot_dimension_numbers<[1], [0], [0], [1], [0, 0, 1, 1], [], []>} : vector<64x64xbf16>, vector<64x128xbf16>, vector<64x128xf32> -> vector<64x128xf32>
    %cst_4 = arith.constant dense<0.000000e+00> : vector<128xf32>
    %9 = vector.multi_reduction <add>, %8, %cst_4 [0] : vector<64x128xf32> to vector<128xf32>
    %10 = vector.shape_cast %9 : vector<128xf32> to vector<1x128xf32>
    %11 = arith.addf %0, %10 : vector<1x128xf32>
    %12 = arith.mulf %8, %8 : vector<64x128xf32>
    %cst_5 = arith.constant dense<0.000000e+00> : vector<128xf32>
    %13 = vector.multi_reduction <add>, %12, %cst_5 [0] : vector<64x128xf32> to vector<128xf32>
    %14 = vector.shape_cast %13 : vector<128xf32> to vector<1x128xf32>
    %15 = arith.addf %0, %14 : vector<1x128xf32>
    %16 = arith.truncf %8 : vector<64x128xf32> to vector<64x128xbf16>
    %c0_6 = arith.constant 0 : index
    %17 = arith.index_cast %2 : i32 to index
    %c0_7 = arith.constant 0 : index
    %18 = vector.load %arg3[%c0_6, %17, %c0_7] : memref<1x64x128xbf16, #tpu.memory_space<vmem>>, vector<1x64x128xbf16>
    %19 = vector.shape_cast %18 : vector<1x64x128xbf16> to vector<64x128xbf16>
    %20 = vector.shape_cast %16 : vector<64x128xbf16> to vector<1x64x128xbf16>
    tpu.vector_store %arg3[%c0_6, %17, %c0_7], %20 {strides = array<i32>} : memref<1x64x128xbf16, #tpu.memory_space<vmem>>, vector<1x64x128xbf16>,
    %c1_i32 = arith.constant 1 : i32
    %cst_8 = arith.constant 1.562500e-02 : f32
    %21 = vector.broadcast %cst_8 : f32 to vector<1x128xf32>
    %22 = arith.mulf %11, %21 : vector<1x128xf32>
    %cst_9 = arith.constant 1.562500e-02 : f32
    %23 = vector.broadcast %cst_9 : f32 to vector<1x128xf32>
    %24 = arith.mulf %15, %23 : vector<1x128xf32>
    %25 = arith.mulf %22, %22 : vector<1x128xf32>
    %26 = arith.subf %24, %25 : vector<1x128xf32>
    %cst_10 = arith.constant 0.000000e+00 : f32
    %27 = vector.broadcast %cst_10 : f32 to vector<1x128xf32>
    %28 = arith.maximumf %26, %27 : vector<1x128xf32>
    %cst_11 = arith.constant 9.99999974E-6 : f32
    %29 = vector.broadcast %cst_11 : f32 to vector<1x128xf32>
    %30 = arith.addf %28, %29 : vector<1x128xf32>
    %31 = math.rsqrt %30 : vector<1x128xf32>
    %c0_i32_12 = arith.constant 0 : i32
    %c64_i32_13 = arith.constant 64 : i32
    %32 = arith.muli %c0_i32_12, %c64_i32_13 : i32
    %33 = tpu.assume_multiple %32, 64 : i32
    %c0_14 = arith.constant 0 : index
    %34 = arith.index_cast %33 : i32 to index
    %c0_15 = arith.constant 0 : index
    %35 = vector.load %arg3[%c0_14, %34, %c0_15] : memref<1x64x128xbf16, #tpu.memory_space<vmem>>, vector<1x64x128xbf16>
    %36 = vector.shape_cast %35 : vector<1x64x128xbf16> to vector<64x128xbf16>
    %37 = arith.extf %36 : vector<64x128xbf16> to vector<64x128xf32>
    %38 = vector.broadcast %22 : vector<1x128xf32> to vector<64x128xf32>
    %39 = arith.subf %37, %38 : vector<64x128xf32>
    %40 = vector.broadcast %31 : vector<1x128xf32> to vector<64x128xf32>
    %41 = arith.mulf %39, %40 : vector<64x128xf32>
    %cst_16 = arith.constant 2.000000e-01 : f32
    %42 = vector.broadcast %cst_16 : f32 to vector<64x128xf32>
    %43 = arith.mulf %42, %41 : vector<64x128xf32>
    %44 = arith.maximumf %41, %43 : vector<64x128xf32>
    %45 = arith.truncf %44 : vector<64x128xf32> to vector<64x128xbf16>
    %c0_17 = arith.constant 0 : index
    %46 = arith.index_cast %33 : i32 to index
    %c0_18 = arith.constant 0 : index
    %47 = vector.load %arg3[%c0_17, %46, %c0_18] : memref<1x64x128xbf16, #tpu.memory_space<vmem>>, vector<1x64x128xbf16>
    %48 = vector.shape_cast %47 : vector<1x64x128xbf16> to vector<64x128xbf16>
    %49 = vector.shape_cast %45 : vector<64x128xbf16> to vector<1x64x128xbf16>
    tpu.vector_store %arg3[%c0_17, %46, %c0_18], %49 {strides = array<i32>} : memref<1x64x128xbf16, #tpu.memory_space<vmem>>, vector<1x64x128xbf16>,
    %c1_i32_19 = arith.constant 1 : i32
    return
  }
  func.func @transform_0(%arg0: i32) -> (i32, i32, i32) {
    %c0_i32 = arith.constant 0 : i32
    %c0_i32_0 = arith.constant 0 : i32
    %c0_i32_1 = arith.constant 0 : i32
    return %arg0, %c0_i32, %c0_i32_0 : i32, i32, i32
  }
  func.func @transform_1(%arg0: i32) -> (i32, i32) {
    %c0_i32 = arith.constant 0 : i32
    %c0_i32_0 = arith.constant 0 : i32
    %c0_i32_1 = arith.constant 0 : i32
    return %c0_i32, %c0_i32_0 : i32, i32
  }
  func.func @transform_2(%arg0: i32) -> (i32, i32, i32) {
    %c0_i32 = arith.constant 0 : i32
    %c0_i32_0 = arith.constant 0 : i32
    %c0_i32_1 = arith.constant 0 : i32
    return %arg0, %c0_i32, %c0_i32_0 : i32, i32, i32
  }
}

</mosaic_0001>

<bundles_post_ra>
// kernel: ck_forward.1
= control target key start
LH: loop header
LB: loop body
LE: loop exit
PB: predicated region body
PF: predicated region fallthrough
CT: control target
= control target key end

     0   :  { %s565_s9 = smov 0   ;;  %s598_s0 = inlined_call_operand.vmem [shape: f32[2,64,64], index: 0, kind: input, shape index: {}]   ;;  %s599_s1 = inlined_call_operand.vmem [shape: bf16[64,128], index: 1, kind: input, shape index: {}]   ;;  %s600_s2 = inlined_call_operand.vmem [shape: bf16[2,64,128], index: 2, kind: output, shape index: {}]  }
   0x1 LB: > { %s418_s10 = sadd.s32 4294967295, %s548_s9   ;;  %p422_p0 = scmp.ge.s32.totalorder %s548_s9, 1  ;;  %s548_s9 = sphi %s565_s9, %s12_s9  }
   0x2   : > { %p112_p1 = scmp.lt.s32.totalorder %s548_s9, 3 }
   0x4   : > { %p113_p2 = pnand %p422_p0, %p112_p1 }
   0x5   : > { %p134_p3 = scmp.lt.s32.totalorder (!%p113_p2), %s418_s10, 1 }
   0x6   : > { %116 = sbr.rel (%p113_p2) target bundleno = 227 (0xe3), region = 28 }
   0xb   : > { %v454_v0 = vld [vmem:[%s599_s1 + $0x18] sm:$0xff]  ;;  %v453_v1 = vld [vmem:[%s599_s1 + $0x10] sm:$0xff]  ;;  %s602_s10 = smov (!%p134_p3, %s418_s10), 1  ;;  %v452_v2 = vld [vmem:[%s599_s1 + $0x8] sm:$0xff]  ;;  %vm189_vm0 = vcmask 523264  }
   0xc   : > { %206 = vmatpush.bf16.msra.mxu0 %v454_v0  ;;  %520 = vmatpush.bf16.msra.mxu1 %v454_v0  ;;  %s449_s15 = sshll.u32 %s602_s10, 6  ;;  %v451_v3 = vld [vmem:[%s599_s1] sm:$0xff]  ;;  %s450_s23 = sshll.u32 %s602_s10, 5 }
   0xd   : > { %521 = vmatpush.bf16.msra.mxu2 %v454_v0  ;;  %522 = vmatpush.bf16.msra.mxu3 %v454_v0  ;;  %s138_s20 = scalar_lea.vmem %s598_s0, %s449_s15  ;;  %s143_s26 = scalar_lea.vmem %s600_s2, %s450_s23 }
   0xe   : > { %v145_v4 = vld [vmem:[%s138_s20] sm:$0xff]  ;;  %v146_v5 = vld [vmem:[%s138_s20 + $0x8] sm:$0xff]  ;;  %v147_v6 = vld [vmem:[%s138_s20 + $0x10] sm:$0xff] }
   0xf   : > { %v148_v7 = vld [vmem:[%s138_s20 + $0x18] sm:$0xff]  ;;  %v149_v8 = vld [vmem:[%s138_s20 + $0x20] sm:$0xff]  ;;  %v150_v9 = vld [vmem:[%s138_s20 + $0x28] sm:$0xff]  ;;  %v153_v12 = vpack.c.bf16 %v146_v5, %v145_v4 }
  0x10   : > { %207 = vmatpush.bf16.msra.mxu0 %v453_v1  ;;  %523 = vmatpush.bf16.msra.mxu1 %v453_v1  ;;  %v151_v10 = vld [vmem:[%s138_s20 + $0x30] sm:$0xff]  ;;  %v152_v11 = vld [vmem:[%s138_s20 + $0x38] sm:$0xff]  ;;  %v154_v13 = vpack.c.bf16 %v148_v7, %v147_v6  ;;  %v155_v14 = vpack.c.bf16 %v150_v9, %v149_v8 }
  0x11   : > { %524 = vmatpush.bf16.msra.mxu2 %v453_v1  ;;  %525 = vmatpush.bf16.msra.mxu3 %v453_v1  ;;  %v156_v15 = vpack.c.bf16 %v152_v11, %v151_v10 }
  0x14   : > { %208 = vmatpush.bf16.msra.mxu0 %v452_v2  ;;  %526 = vmatpush.bf16.msra.mxu1 %v452_v2 }
  0x15   : > { %527 = vmatpush.bf16.msra.mxu2 %v452_v2  ;;  %528 = vmatpush.bf16.msra.mxu3 %v452_v2 }
  0x18   : > { %209 = vmatpush.bf16.msra.mxu0 %v451_v3  ;;  %529 = vmatpush.bf16.msra.mxu1 %v451_v3 }
  0x19   : > { %530 = vmatpush.bf16.msra.mxu2 %v451_v3  ;;  %531 = vmatpush.bf16.msra.mxu3 %v451_v3 }
  0x1b   : > { %443 = vmatmul.msk.bf16.vlgmr.msra.gmra.mxu0 %vm189_vm0, %v153_v12  ;;  %444 = vmatmul.msk.bf16.vlgmr.msra.gmra.mxu1 %vm189_vm0, %v154_v13 }
  0x1c   : > { %445 = vmatmul.msk.bf16.vlgmr.msra.gmra.mxu2 %vm189_vm0, %v155_v14  ;;  %446 = vmatmul.msk.bf16.vlgmr.msra.gmra.mxu3 %vm189_vm0, %v156_v15 }
  0x98   : > { %v211_v16 = vpop.f32.mrf.mxu0  ;;  %v216_v17 = vpop.f32.mrf.mxu1 }
  0x99   : > { %v245_v21 = vmul.f32 %v211_v16, %v211_v16  ;;  %v247_v25 = vmul.f32 %v216_v17, %v216_v17 }
  0x9f   : > { %v221_v18 = vpop.f32.mrf.mxu2  ;;  %v226_v19 = vpop.f32.mrf.mxu3 }
  0xa0   : > { %v213_v20 = vpop.f32.mrf.mxu0  ;;  %v218_v24 = vpop.f32.mrf.mxu1  ;;  %v249_v31 = vmul.f32 %v221_v18, %v221_v18  ;;  %v251_v39 = vmul.f32 %v226_v19, %v226_v19 }
  0xa1   : > { %v231_v22 = vadd.f32 %v213_v20, %v211_v16  ;;  %v246_v23 = vmul.f32 %v213_v20, %v213_v20  ;;  %v248_v29 = vmul.f32 %v218_v24, %v218_v24  ;;  %v458_v2 = vpack.c.bf16 %v213_v20, %v211_v16 }
  0xa2   : > { %v463_v3 = vpack.c.bf16 %v218_v24, %v216_v17 }
  0xa3   : > { %v253_v26 = vadd.f32 %v246_v23, %v245_v21  ;;  %v232_v27 = vadd.f32 %v231_v22, %v216_v17  ;;  %v477_v8 = vunpack.c.l.bf16 %v458_v2  ;;  %v478_v9 = vunpack.c.h.bf16 %v458_v2 }
  0xa4   : > { %v481_v10 = vunpack.c.l.bf16 %v463_v3  ;;  %v482_v12 = vunpack.c.h.bf16 %v463_v3 }
  0xa5   : > { %v233_v28 = vadd.f32 %v232_v27, %v218_v24  ;;  %v254_v30 = vadd.f32 %v253_v26, %v247_v25 }
  0xa7   : > { %v255_v32 = vadd.f32 %v254_v30, %v248_v29  ;;  %v223_v33 = vpop.f32.mrf.mxu2  ;;  %v234_v34 = vadd.f32 %v233_v28, %v221_v18  ;;  %v228_v38 = vpop.f32.mrf.mxu3 }
  0xa8   : > { %v250_v36 = vmul.f32 %v223_v33, %v223_v33  ;;  %v252_v43 = vmul.f32 %v228_v38, %v228_v38  ;;  %v468_v5 = vpack.c.bf16 %v223_v33, %v221_v18  ;;  %v473_v6 = vpack.c.bf16 %v228_v38, %v226_v19 }
  0xa9   : > { %v235_v35 = vadd.f32 %v234_v34, %v223_v33  ;;  %v256_v37 = vadd.f32 %v255_v32, %v249_v31 }
  0xaa   : > { %v485_v13 = vunpack.c.l.bf16 %v468_v5  ;;  %v486_v14 = vunpack.c.h.bf16 %v468_v5  ;;  %v489_v15 = vunpack.c.l.bf16 %v473_v6  ;;  %v490_v22 = vunpack.c.h.bf16 %v473_v6 }
  0xab   : > { %v257_v40 = vadd.f32 %v256_v37, %v250_v36  ;;  %v236_v41 = vadd.f32 %v235_v35, %v226_v19 }
  0xad   : > { %v237_v42 = vadd.f32 %v236_v41, %v228_v38  ;;  %v258_v44 = vadd.f32 %v257_v40, %v251_v39 }
  0xaf   : > { %v238_v45 = vrot.slane %v237_v42, 4  ;;  %v259_v46 = vadd.f32 %v258_v44, %v252_v43 }
  0xb1   : > { %v239_v47 = vadd.f32 %v238_v45, %v237_v42  ;;  %v260_v48 = vrot.slane %v259_v46, 4 }
  0xb3   : > { %v240_v49 = vrot.slane %v239_v47, 2  ;;  %v261_v50 = vadd.f32 %v260_v48, %v259_v46 }
  0xb5   : > { %v241_v51 = vadd.f32 %v240_v49, %v239_v47  ;;  %v262_v52 = vrot.slane %v261_v50, 2 }
  0xb7   : > { %v242_v53 = vrot.slane %v241_v51, 1  ;;  %v263_v54 = vadd.f32 %v262_v52, %v261_v50 }
  0xb9   : > { %v243_v55 = vadd.f32 %v242_v53, %v241_v51  ;;  %v264_v56 = vrot.slane %v263_v54, 1 }
  0xbb   : > { %v265_v57 = vadd.f32 %v264_v56, %v263_v54  ;;  %v283_v58 = vmul.f32 0.015625, %v243_v55 }
  0xbd   : > { %v284_v59 = vmul.f32 0.015625, %v265_v57  ;;  %v285_v60 = vmul.f32 %v283_v58, %v283_v58  ;;  %v315_v23 = vsub.f32 %v477_v8, %v283_v58  ;;  %v316_v16 = vsub.f32 %v478_v9, %v283_v58 }
  0xbe   : > { %v317_v17 = vsub.f32 %v481_v10, %v283_v58  ;;  %v318_v18 = vsub.f32 %v482_v12, %v283_v58  ;;  %v319_v19 = vsub.f32 %v485_v13, %v283_v58  ;;  %v320_v24 = vsub.f32 %v486_v14, %v283_v58 }
  0xbf   : > { %v286_v61 = vsub.f32 %v284_v59, %v285_v60  ;;  %v321_v25 = vsub.f32 %v489_v15, %v283_v58  ;;  %v322_v26 = vsub.f32 %v490_v22, %v283_v58 }
  0xc1   : > { %v287_v62 = vmax.f32 %v286_v61, 0.0 }
  0xc3   : > { %v288_v63 = vadd.f32 1e-05, %v287_v62 }
  0xc5   : > { %540 = vrsqrt.f32 %v288_v63  ;;  %vm295_vm2 = vweird.f32 %v288_v63 }
  0xcb   : > { %v541_v0 = vpop.eup %540 }
  0xcc   : > { %v290_v1 = vmul.f32 %v541_v0, %v288_v63  ;;  %vm296_vm1 = vweird.f32 %v541_v0 }
  0xcd   : > { %vm297_vm3 = vmor %vm295_vm2, %vm296_vm1 }
  0xce   : > { %v291_v4 = vmul.f32 %v541_v0, %v290_v1 }
  0xd0   : > { %v292_v7 = vmul.f32 0.5, %v291_v4 }
  0xd2   : > { %v293_v11 = vsub.f32 1.5, %v292_v7 }
  0xd4   : > { %v294_v21 = vmul.f32 %v541_v0, %v293_v11 }
  0xd6   : > { %v298_v20 = vsel %vm297_vm3, %v541_v0, %v294_v21 }
  0xd7   : > { %v323_v27 = vmul.f32 %v315_v23, %v298_v20  ;;  %v324_v28 = vmul.f32 %v316_v16, %v298_v20  ;;  %v325_v29 = vmul.f32 %v317_v17, %v298_v20  ;;  %v326_v30 = vmul.f32 %v318_v18, %v298_v20 }
  0xd8   : > { %v327_v31 = vmul.f32 %v319_v19, %v298_v20  ;;  %v328_v32 = vmul.f32 %v320_v24, %v298_v20  ;;  %v329_v33 = vmul.f32 %v321_v25, %v298_v20  ;;  %v330_v34 = vmul.f32 %v322_v26, %v298_v20 }
  0xd9   : > { %v331_v35 = vmul.f32 0.2, %v323_v27  ;;  %v332_v36 = vmul.f32 0.2, %v324_v28  ;;  %v333_v37 = vmul.f32 0.2, %v325_v29 }
  0xda   : > { %v334_v38 = vmul.f32 0.2, %v326_v30  ;;  %v335_v39 = vmul.f32 0.2, %v327_v31  ;;  %v336_v40 = vmul.f32 0.2, %v328_v32 }
  0xdb   : > { %v337_v41 = vmul.f32 0.2, %v329_v33  ;;  %v338_v42 = vmul.f32 0.2, %v330_v34  ;;  %v339_v43 = vmax.f32 %v323_v27, %v331_v35  ;;  %v340_v44 = vmax.f32 %v324_v28, %v332_v36 }
  0xdc   : > { %v341_v45 = vmax.f32 %v325_v29, %v333_v37  ;;  %v342_v46 = vmax.f32 %v326_v30, %v334_v38  ;;  %v343_v47 = vmax.f32 %v327_v31, %v335_v39  ;;  %v344_v48 = vmax.f32 %v328_v32, %v336_v40 }
  0xdd   : > { %v345_v49 = vmax.f32 %v329_v33, %v337_v41  ;;  %v346_v50 = vmax.f32 %v330_v34, %v338_v42  ;;  %v494_v51 = vpack.c.bf16 %v340_v44, %v339_v43 }
  0xde   : > { %v499_v52 = vpack.c.bf16 %v342_v46, %v341_v45  ;;  %v504_v53 = vpack.c.bf16 %v344_v48, %v343_v47 }
  0xdf   : > { %495 = vst [vmem:[%s143_s26] sm:$0xff] %v494_v51   ;;  %v509_v54 = vpack.c.bf16 %v346_v50, %v345_v49 }
  0xe0   : > { %517 = vst [vmem:[%s143_s26 + $0x8] sm:$0xff] %v499_v52  }
  0xe1   : > { %518 = vst [vmem:[%s143_s26 + $0x10] sm:$0xff] %v504_v53  }
  0xe2   : > { %519 = vst [vmem:[%s143_s26 + $0x18] sm:$0xff] %v509_v54  }
  0xe3 PF: > { %s12_s9 = sadd.s32 1, %s548_s9  }
  0xe4   : > { %p9_p4 = scmp.ge.s32.totalorder %s12_s9, 4  }
  0xe6   :  { %11 = sbr.rel (!%p9_p4) target bundleno = 1 (0x1), region = 58 }

</bundles_post_ra>
